<compile_context>
chip_gen: v5e
topology: v5e:2x2
jax: 0.10.0
libtpu: 0.0.40
codegen_flags: <defaults>
</compile_context>

<pallas_src>
import functools

import jax
import jax.numpy as jnp
from jax import lax
from jax.experimental import pallas as pl
from jax.experimental.pallas import tpu as pltpu


_MASK_VALUE = -1e30  # large finite negative; exp() underflows to exactly 0


def _attn_head_kernel(x_ref, wqkv_ref, o_ref,
                      q_s, k_s, v_s, m_s, l_s, acc_s,
                      *, tk, compute_dtype):
    # x_ref   : (1, T, E)     full sequence of x (re-DMA'd only when b changes)
    # wqkv_ref: (E, 3*Hd)     fused [Wq | Wk | Wv], grid-invariant (resident)
    # o_ref   : (1, tq, Hd)   this query tile's output
    # q_s     : (n_q*tq, Hd)  per-batch pre-scaled Q   (computed once at i == 0)
    # k_s,v_s : (n_kv*tk, Hd) per-batch K / V          (computed once at i == 0)
    # m_s,l_s : (tq, 1) f32   online-softmax running max / denominator
    # acc_s   : (tq, Hd) f32  online-softmax accumulator
    T = x_ref.shape[1]
    E = x_ref.shape[2]
    tq = o_ref.shape[1]
    Hd = o_ref.shape[2]
    scale = float(E) ** -0.5          # module uses C**-0.5 with C = embed_size

    i = pl.program_id(1)

    # ---- per-batch fused QKV projection (runs only on the first query tile) ----
    @pl.when(i == 0)
    def _project():
        # Zero padded rows only when padding exists (garbage there would be
        # masked / discarded anyway, but keep it clean).
        if q_s.shape[0] > T:
            q_s[...] = jnp.zeros_like(q_s)
        if k_s.shape[0] > T:
            k_s[...] = jnp.zeros_like(k_s)
            v_s[...] = jnp.zeros_like(v_s)
        x = x_ref[0].astype(compute_dtype)                        # (T, E)
        w = wqkv_ref[...].astype(compute_dtype)                   # (E, 3*Hd)
        qkv = jnp.dot(x, w, preferred_element_type=jnp.float32)   # (T, 3*Hd) f32
        # Fold the 1/sqrt(C) scale into Q here: T*Hd multiplies once per batch.
        q_s[pl.ds(0, T), :] = (qkv[:, 0:Hd] * scale).astype(q_s.dtype)
        k_s[pl.ds(0, T), :] = qkv[:, Hd:2 * Hd].astype(k_s.dtype)
        v_s[pl.ds(0, T), :] = qkv[:, 2 * Hd:3 * Hd].astype(v_s.dtype)

    # ---- this query tile ----
    q0 = pl.multiple_of(i * tq, tq)
    q = q_s[pl.ds(q0, tq), :]                                     # (tq, Hd), pre-scaled

    m_s[...] = jnp.full_like(m_s, -jnp.inf)
    l_s[...] = jnp.zeros_like(l_s)
    acc_s[...] = jnp.zeros_like(acc_s)

    # Only key tiles intersecting the causal prefix [0, min(q0+tq, T)) are visited.
    n_kv = pl.cdiv(jnp.minimum(q0 + tq, T), tk)

    @pl.loop(0, n_kv)
    def _kv_step(kv_i):
        k0 = pl.multiple_of(kv_i * tk, tk)
        k_t = k_s[pl.ds(k0, tk), :]                               # (tk, Hd)
        v_t = v_s[pl.ds(k0, tk), :]
        s = lax.dot_general(q, k_t, (((1,), (1,)), ((), ())),
                            preferred_element_type=jnp.float32)   # (tq, tk) f32
        rows = q0 + lax.broadcasted_iota(jnp.int32, (tq, tk), 0)
        cols = k0 + lax.broadcasted_iota(jnp.int32, (tq, tk), 1)
        s = jnp.where((cols <= rows) & (cols < T), s, _MASK_VALUE)

        m_prev = m_s[...]
        m_new = jnp.maximum(m_prev, jnp.max(s, axis=-1, keepdims=True))
        alpha = jnp.exp(m_prev - m_new)
        p = jnp.exp(s - m_new)
        l_s[...] = alpha * l_s[...] + jnp.sum(p, axis=-1, keepdims=True)
        acc_s[...] = alpha * acc_s[...] + jnp.dot(
            p.astype(compute_dtype), v_t, preferred_element_type=jnp.float32)
        m_s[...] = m_new

    # TODO(synk): training-mode Dropout(0.1) on attention probabilities is
    # omitted (inference identity); if needed, draw the mask in-kernel with
    # pltpu.prng_seed + pltpu.prng_random_bits inside _kv_step.

    inv_l = pl.reciprocal(l_s[...], approx=True)
    o_ref[0] = (acc_s[...] * inv_l).astype(o_ref.dtype)


def self_attention_head(x, wq, wk, wv, *, tq=None, tk=None,
                        compute_dtype=jnp.bfloat16, interpret=False):
    """x: (B, T, E). wq/wk/wv: (E, head_size). Returns (B, T, head_size)."""
    B, T, E = x.shape
    Hd = wq.shape[1]
    assert wq.shape == (E, Hd) and wk.shape == (E, Hd) and wv.shape == (E, Hd)

    # ---- tile selection (sweepable; defaults amortize per-step overhead) ----
    if tq is None:
        tq = T if T <= 256 else 256
    if tk is None:
        tk = T if T <= 512 else 512
    n_q = pl.cdiv(T, tq)
    n_kv_tiles = pl.cdiv(T, tk)
    sub = 32 // jnp.dtype(compute_dtype).itemsize  # sublane tile (8 f32 / 16 bf16)
    if n_q > 1:
        assert tq % sub == 0, f"tq must be a multiple of {sub} (or the full T)"
    if n_kv_tiles > 1:
        assert tk % sub == 0, f"tk must be a multiple of {sub} (or the full T)"
    tq_pad_rows = n_q * tq           # Q scratch padded so dynamic slices stay in-bounds
    tk_pad_rows = n_kv_tiles * tk    # K/V scratch padded likewise (pad is zeroed/masked)

    # Fused projection weight: one MXU push, 3x output-lane utilization.
    wqkv = jnp.concatenate([wq, wk, wv], axis=1)                  # (E, 3*Hd)

    it_in = jnp.dtype(x.dtype).itemsize
    cdt_sz = jnp.dtype(compute_dtype).itemsize

    # Advisory cost estimate (causal ~ half the score elements).
    n_scores = B * (T * (T + tq)) // 2
    cost = pl.CostEstimate(
        flops=2 * B * T * E * 3 * Hd + 2 * 2 * Hd * n_scores,
        transcendentals=n_scores,
        bytes_accessed=(B * T * E + 3 * E * Hd) * it_in + B * T * Hd * it_in,
    )

    # VMEM budget: raise the scoped limit only when the resident blocks need it
    # (v5e default 16 MiB, v6e/v7x 32 MiB; cap at v7x's 64 MiB physical).  For
    # very large T*E, additionally pass x in bf16 and/or shrink tq/tk.
    vmem_est = (
        2 * T * E * it_in                                   # double-buffered x block
        + 2 * E * 3 * Hd * it_in                            # double-buffered weights
        + 2 * 2 * tq * Hd * it_in                           # double-buffered out tile
        + (tq_pad_rows + 2 * tk_pad_rows) * Hd * cdt_sz     # Q/K/V scratch
        + (tq * Hd + 2 * tq) * 4                            # acc/m/l scratch
        + 6 * tq * tk * 4                                   # score/prob temporaries
    )
    compiler_kwargs = dict(dimension_semantics=("parallel", "arbitrary"))
    if vmem_est > (16 << 20):
        compiler_kwargs["vmem_limit_bytes"] = int(min(vmem_est + (8 << 20), 64 << 20))

    kernel = functools.partial(_attn_head_kernel, tk=tk, compute_dtype=compute_dtype)

    return pl.pallas_call(
        kernel,
        out_shape=jax.ShapeDtypeStruct((B, T, Hd), x.dtype),
        grid_spec=pltpu.PrefetchScalarGridSpec(
            num_scalar_prefetch=0,
            grid=(B, n_q),
            in_specs=[
                pl.BlockSpec((1, T, E), lambda b, i: (b, 0, 0)),      # x: one DMA per batch
                pl.BlockSpec((E, 3 * Hd), lambda b, i: (0, 0)),       # fused Wqkv (resident)
            ],
            out_specs=pl.BlockSpec((1, tq, Hd), lambda b, i: (b, i, 0)),
            scratch_shapes=[
                pltpu.VMEM((tq_pad_rows, Hd), compute_dtype),   # Q (pre-scaled)
                pltpu.VMEM((tk_pad_rows, Hd), compute_dtype),   # K
                pltpu.VMEM((tk_pad_rows, Hd), compute_dtype),   # V
                pltpu.VMEM((tq, 1), jnp.float32),               # m (running max)
                pltpu.VMEM((tq, 1), jnp.float32),               # l (denominator)
                pltpu.VMEM((tq, Hd), jnp.float32),              # acc
            ],
        ),
        compiler_params=pltpu.CompilerParams(**compiler_kwargs),
        cost_estimate=cost,
        interpret=interpret,
    )(x, wqkv)


def init_params(key, embed_size, head_size):
    """nn.Linear(embed, head, bias=False) default init, stored as (in, out)."""
    kq, kk, kv = jax.random.split(key, 3)
    lim = 1.0 / jnp.sqrt(embed_size)
    wq = jax.random.uniform(kq, (embed_size, head_size), jnp.float32, -lim, lim)
    wk = jax.random.uniform(kk, (embed_size, head_size), jnp.float32, -lim, lim)
    wv = jax.random.uniform(kv, (embed_size, head_size), jnp.float32, -lim, lim)
    return wq, wk, wv


def _reference(x, wq, wk, wv):
    """Plain-JAX reference (same inference semantics; dropout = identity)."""
    B, T, E = x.shape
    q = x @ wq
    k = x @ wk
    v = x @ wv
    wei = jnp.einsum("btd,bsd->bts", q, k) * (float(E) ** -0.5)
    causal = jnp.tril(jnp.ones((T, T), dtype=bool))
    wei = jnp.where(causal[None], wei, -jnp.inf)
    wei = jax.nn.softmax(wei, axis=-1)
    return jnp.einsum("bts,bsd->btd", wei, v)


if __name__ == "__main__":
    key = jax.random.PRNGKey(0)
    kx, kp = jax.random.split(key)

    # ---- small shapes consistent with the module (block_size=64 >= T) ----
    B, T, E, Hd = 2, 8, 32, 16
    x = jax.random.normal(kx, (B, T, E), jnp.float32)
    wq, wk, wv = init_params(kp, E, Hd)
    ref = _reference(x, wq, wk, wv)

    # Default path: bf16 MXU operands, f32 accumulation.
    out = jax.block_until_ready(self_attention_head(x, wq, wk, wv))
    assert out.shape == (B, T, Hd)
    err = float(jnp.max(jnp.abs(out - ref)))
    assert jnp.allclose(out, ref, atol=2.5e-2, rtol=2.5e-2), f"bf16 path max err {err}"

    # Exact-precision path (f32 matmul operands) — validates the algorithm tightly.
    out32 = jax.block_until_ready(
        self_attention_head(x, wq, wk, wv, compute_dtype=jnp.float32))
    err32 = float(jnp.max(jnp.abs(out32 - ref)))
    assert jnp.allclose(out32, ref, atol=2e-3, rtol=2e-3), f"f32 path max err {err32}"

    # Multi-tile path: exercises per-batch QKV caching across query tiles and the
    # causal key-tile skip (query tile 0 visits 1 key tile, query tile 1 visits 2).
    T2 = 64
    x2 = jax.random.normal(jax.random.fold_in(kx, 1), (B, T2, E), jnp.float32)
    ref2 = _reference(x2, wq, wk, wv)
    out2 = jax.block_until_ready(self_attention_head(x2, wq, wk, wv, tq=32, tk=32))
    err2 = float(jnp.max(jnp.abs(out2 - ref2)))
    assert jnp.allclose(out2, ref2, atol=2.5e-2, rtol=2.5e-2), f"tiled path max err {err2}"

    print("KERNEL_OK")
</pallas_src>

<mosaic_0001>
module attributes {stable_mosaic.version = 11 : i64} {
  func.func @_attn_head_kernel(%arg0: i32, %arg1: i32, %arg2: memref<1x8x32xf32, #tpu.memory_space<vmem>>, %arg3: memref<32x48xf32, #tpu.memory_space<vmem>>, %arg4: memref<1x8x16xf32, #tpu.memory_space<vmem>>, %arg5: memref<8x16xbf16, #tpu.memory_space<vmem>>, %arg6: memref<8x16xbf16, #tpu.memory_space<vmem>>, %arg7: memref<8x16xbf16, #tpu.memory_space<vmem>>, %arg8: memref<8x1xf32, #tpu.memory_space<vmem>>, %arg9: memref<8x1xf32, #tpu.memory_space<vmem>>, %arg10: memref<8x16xf32, #tpu.memory_space<vmem>>) attributes {dimension_semantics = [#tpu.dimension_semantics<parallel>, #tpu.dimension_semantics<arbitrary>], iteration_bounds = array<i64: 2, 1>, scalar_prefetch = 0 : i64, scratch_operands = 6 : i64, tpu.core_type = #tpu.core_type<tc>, window_params = [{transform_indices = @transform_0, window_bounds = array<i64: 1, 8, 32>}, {pipeline_mode = #tpu.pipeline_mode<synchronous>, transform_indices = @transform_1, window_bounds = array<i64: 32, 48>}, {transform_indices = @transform_2, window_bounds = array<i64: 1, 8, 16>}]} {
    %c0_i32 = arith.constant 0 : i32
    %0 = arith.cmpi eq, %arg1, %c0_i32 : i32
    %1 = arith.extui %0 : i1 to i32
    %c0_i32_0 = arith.constant 0 : i32
    %2 = arith.cmpi ne, %1, %c0_i32_0 : i32
    scf.if %2 {
      %c0_26 = arith.constant 0 : index
      %c0_27 = arith.constant 0 : index
      %c0_28 = arith.constant 0 : index
      %31 = vector.load %arg2[%c0_26, %c0_27, %c0_28] : memref<1x8x32xf32, #tpu.memory_space<vmem>>, vector<1x8x32xf32>
      %32 = vector.shape_cast %31 : vector<1x8x32xf32> to vector<8x32xf32>
      %33 = arith.truncf %32 : vector<8x32xf32> to vector<8x32xbf16>
      %c0_29 = arith.constant 0 : index
      %c0_30 = arith.constant 0 : index
      %34 = vector.load %arg3[%c0_29, %c0_30] : memref<32x48xf32, #tpu.memory_space<vmem>>, vector<32x48xf32>
      %35 = arith.truncf %34 : vector<32x48xf32> to vector<32x48xbf16>
      %cst_31 = arith.constant dense<0.000000e+00> : vector<8x48xf32>
      %36 = tpu.matmul %33, %35, %cst_31 {dimension_numbers = #tpu.dot_dimension_numbers<[1], [0], [0], [1], [0, 0, 1, 1], [], []>} : vector<8x32xbf16>, vector<32x48xbf16>, vector<8x48xf32> -> vector<8x48xf32>
      %37 = vector.extract_strided_slice %36 {offsets = [0, 0], sizes = [8, 16], strides = [1, 1]} : vector<8x48xf32> to vector<8x16xf32>
      %cst_32 = arith.constant 0.176776692 : f32
      %38 = vector.broadcast %cst_32 : f32 to vector<8x16xf32>
      %39 = arith.mulf %37, %38 : vector<8x16xf32>
      %40 = arith.truncf %39 : vector<8x16xf32> to vector<8x16xbf16>
      %c0_33 = arith.constant 0 : index
      %c0_34 = arith.constant 0 : index
      %41 = vector.load %arg5[%c0_33, %c0_34] : memref<8x16xbf16, #tpu.memory_space<vmem>>, vector<8x16xbf16>
      tpu.vector_store %arg5[%c0_33, %c0_34], %40 {strides = array<i32>} : memref<8x16xbf16, #tpu.memory_space<vmem>>, vector<8x16xbf16>,
      %42 = vector.extract_strided_slice %36 {offsets = [0, 16], sizes = [8, 16], strides = [1, 1]} : vector<8x48xf32> to vector<8x16xf32>
      %43 = arith.truncf %42 : vector<8x16xf32> to vector<8x16xbf16>
      %c0_35 = arith.constant 0 : index
      %c0_36 = arith.constant 0 : index
      %44 = vector.load %arg6[%c0_35, %c0_36] : memref<8x16xbf16, #tpu.memory_space<vmem>>, vector<8x16xbf16>
      tpu.vector_store %arg6[%c0_35, %c0_36], %43 {strides = array<i32>} : memref<8x16xbf16, #tpu.memory_space<vmem>>, vector<8x16xbf16>,
      %45 = vector.extract_strided_slice %36 {offsets = [0, 32], sizes = [8, 16], strides = [1, 1]} : vector<8x48xf32> to vector<8x16xf32>
      %46 = arith.truncf %45 : vector<8x16xf32> to vector<8x16xbf16>
      %c0_37 = arith.constant 0 : index
      %c0_38 = arith.constant 0 : index
      %47 = vector.load %arg7[%c0_37, %c0_38] : memref<8x16xbf16, #tpu.memory_space<vmem>>, vector<8x16xbf16>
      tpu.vector_store %arg7[%c0_37, %c0_38], %46 {strides = array<i32>} : memref<8x16xbf16, #tpu.memory_space<vmem>>, vector<8x16xbf16>,
    } else {
    }
    %c8_i32 = arith.constant 8 : i32
    %3 = arith.muli %arg1, %c8_i32 : i32
    %4 = tpu.assume_multiple %3, 8 : i32
    %5 = arith.index_cast %4 : i32 to index
    %c0 = arith.constant 0 : index
    %6 = vector.load %arg5[%5, %c0] : memref<8x16xbf16, #tpu.memory_space<vmem>>, vector<8x16xbf16>
    %cst = arith.constant 0xFF800000 : f32
    %7 = vector.broadcast %cst : f32 to vector<8x1xf32>
    %c0_1 = arith.constant 0 : index
    %c0_2 = arith.constant 0 : index
    %8 = vector.load %arg8[%c0_1, %c0_2] : memref<8x1xf32, #tpu.memory_space<vmem>>, vector<8x1xf32>
    tpu.vector_store %arg8[%c0_1, %c0_2], %7 {strides = array<i32>} : memref<8x1xf32, #tpu.memory_space<vmem>>, vector<8x1xf32>,
    %cst_3 = arith.constant 0.000000e+00 : f32
    %9 = vector.broadcast %cst_3 : f32 to vector<8x1xf32>
    %c0_4 = arith.constant 0 : index
    %c0_5 = arith.constant 0 : index
    %10 = vector.load %arg9[%c0_4, %c0_5] : memref<8x1xf32, #tpu.memory_space<vmem>>, vector<8x1xf32>
    tpu.vector_store %arg9[%c0_4, %c0_5], %9 {strides = array<i32>} : memref<8x1xf32, #tpu.memory_space<vmem>>, vector<8x1xf32>,
    %cst_6 = arith.constant 0.000000e+00 : f32
    %11 = vector.broadcast %cst_6 : f32 to vector<8x16xf32>
    %c0_7 = arith.constant 0 : index
    %c0_8 = arith.constant 0 : index
    %12 = vector.load %arg10[%c0_7, %c0_8] : memref<8x16xf32, #tpu.memory_space<vmem>>, vector<8x16xf32>
    tpu.vector_store %arg10[%c0_7, %c0_8], %11 {strides = array<i32>} : memref<8x16xf32, #tpu.memory_space<vmem>>, vector<8x16xf32>,
    %c8_i32_9 = arith.constant 8 : i32
    %13 = arith.addi %4, %c8_i32_9 : i32
    %c8_i32_10 = arith.constant 8 : i32
    %14 = arith.minsi %13, %c8_i32_10 : i32
    %c7_i32 = arith.constant 7 : i32
    %15 = arith.addi %14, %c7_i32 : i32
    %c8_i32_11 = arith.constant 8 : i32
    %16 = arith.divsi %15, %c8_i32_11 : i32
    %c0_i32_12 = arith.constant 0 : i32
    %17 = arith.subi %16, %c0_i32_12 : i32
    %c1_i32 = arith.constant 1 : i32
    %c1_i32_13 = arith.constant 1 : i32
    %18 = arith.subi %c1_i32, %c1_i32_13 : i32
    %19 = arith.addi %17, %18 : i32
    %c1_i32_14 = arith.constant 1 : i32
    %20 = arith.divsi %19, %c1_i32_14 : i32
    %c1_i32_15 = arith.constant 1 : i32
    %c0_i32_16 = arith.constant 0 : i32
    %c0_i32_17 = arith.constant 0 : i32
    %21 = arith.subi %20, %c0_i32_17 : i32
    %22 = arith.addi %c0_i32_17, %21 : i32
    %c1_i32_18 = arith.constant 1 : i32
    scf.for %arg11 = %c0_i32_17 to %22 step %c1_i32_18  : i32 {
      %31 = arith.muli %arg11, %c1_i32_15 : i32
      %32 = arith.addi %c0_i32_16, %31 : i32
      %c8_i32_26 = arith.constant 8 : i32
      %33 = arith.muli %32, %c8_i32_26 : i32
      %34 = tpu.assume_multiple %33, 8 : i32
      %35 = arith.index_cast %34 : i32 to index
      %c0_27 = arith.constant 0 : index
      %36 = vector.load %arg6[%35, %c0_27] : memref<8x16xbf16, #tpu.memory_space<vmem>>, vector<8x16xbf16>
      %37 = arith.index_cast %34 : i32 to index
      %c0_28 = arith.constant 0 : index
      %38 = vector.load %arg7[%37, %c0_28] : memref<8x16xbf16, #tpu.memory_space<vmem>>, vector<8x16xbf16>
      %cst_29 = arith.constant dense<0.000000e+00> : vector<8x8xf32>
      %39 = tpu.matmul %6, %36, %cst_29 {dimension_numbers = #tpu.dot_dimension_numbers<[1], [1], [0], [0], [0, 0, 1, 0], [], []>} : vector<8x16xbf16>, vector<8x16xbf16>, vector<8x8xf32> -> vector<8x8xf32>
      %40 = tpu.iota {dimensions = array<i32: 0>} : vector<8x8xi32>
      %41 = vector.broadcast %4 : i32 to vector<8x8xi32>
      %42 = arith.addi %41, %40 : vector<8x8xi32>
      %43 = tpu.iota {dimensions = array<i32: 1>} : vector<8x8xi32>
      %44 = vector.broadcast %34 : i32 to vector<8x8xi32>
      %45 = arith.addi %44, %43 : vector<8x8xi32>
      %46 = arith.cmpi sle, %45, %42 : vector<8x8xi32>
      %c8_i32_30 = arith.constant 8 : i32
      %47 = vector.broadcast %c8_i32_30 : i32 to vector<8x8xi32>
      %48 = arith.cmpi slt, %45, %47 : vector<8x8xi32>
      %49 = arith.andi %46, %48 : vector<8x8xi1>
      %cst_31 = arith.constant -1.000000e+30 : f32
      %50 = vector.broadcast %cst_31 : f32 to vector<8x8xf32>
      %51 = arith.select %49, %39, %50 : vector<8x8xi1>, vector<8x8xf32>
      %c0_32 = arith.constant 0 : index
      %c0_33 = arith.constant 0 : index
      %52 = vector.load %arg8[%c0_32, %c0_33] : memref<8x1xf32, #tpu.memory_space<vmem>>, vector<8x1xf32>
      %cst_34 = arith.constant dense<0xFF800000> : vector<8xf32>
      %53 = vector.multi_reduction <maximumf>, %51, %cst_34 [1] : vector<8x8xf32> to vector<8xf32>
      %54 = vector.shape_cast %53 : vector<8xf32> to vector<8x1xf32>
      %55 = arith.maximumf %52, %54 : vector<8x1xf32>
      %56 = arith.subf %52, %55 : vector<8x1xf32>
      %57 = math.exp %56 : vector<8x1xf32>
      %58 = vector.broadcast %55 : vector<8x1xf32> to vector<8x8xf32>
      %59 = arith.subf %51, %58 : vector<8x8xf32>
      %60 = math.exp %59 : vector<8x8xf32>
      %c0_35 = arith.constant 0 : index
      %c0_36 = arith.constant 0 : index
      %61 = vector.load %arg9[%c0_35, %c0_36] : memref<8x1xf32, #tpu.memory_space<vmem>>, vector<8x1xf32>
      %62 = arith.mulf %57, %61 : vector<8x1xf32>
      %cst_37 = arith.constant dense<0.000000e+00> : vector<8xf32>
      %63 = vector.multi_reduction <add>, %60, %cst_37 [1] : vector<8x8xf32> to vector<8xf32>
      %64 = vector.shape_cast %63 : vector<8xf32> to vector<8x1xf32>
      %65 = arith.addf %62, %64 : vector<8x1xf32>
      %c0_38 = arith.constant 0 : index
      %c0_39 = arith.constant 0 : index
      %66 = vector.load %arg9[%c0_38, %c0_39] : memref<8x1xf32, #tpu.memory_space<vmem>>, vector<8x1xf32>
      tpu.vector_store %arg9[%c0_38, %c0_39], %65 {strides = array<i32>} : memref<8x1xf32, #tpu.memory_space<vmem>>, vector<8x1xf32>,
      %c0_40 = arith.constant 0 : index
      %c0_41 = arith.constant 0 : index
      %67 = vector.load %arg10[%c0_40, %c0_41] : memref<8x16xf32, #tpu.memory_space<vmem>>, vector<8x16xf32>
      %68 = vector.broadcast %57 : vector<8x1xf32> to vector<8x16xf32>
      %69 = arith.mulf %68, %67 : vector<8x16xf32>
      %70 = arith.truncf %60 : vector<8x8xf32> to vector<8x8xbf16>
      %cst_42 = arith.constant dense<0.000000e+00> : vector<8x16xf32>
      %71 = tpu.matmul %70, %38, %cst_42 {dimension_numbers = #tpu.dot_dimension_numbers<[1], [0], [0], [1], [0, 0, 1, 1], [], []>} : vector<8x8xbf16>, vector<8x16xbf16>, vector<8x16xf32> -> vector<8x16xf32>
      %72 = arith.addf %69, %71 : vector<8x16xf32>
      %c0_43 = arith.constant 0 : index
      %c0_44 = arith.constant 0 : index
      %73 = vector.load %arg10[%c0_43, %c0_44] : memref<8x16xf32, #tpu.memory_space<vmem>>, vector<8x16xf32>
      tpu.vector_store %arg10[%c0_43, %c0_44], %72 {strides = array<i32>} : memref<8x16xf32, #tpu.memory_space<vmem>>, vector<8x16xf32>,
      %c0_45 = arith.constant 0 : index
      %c0_46 = arith.constant 0 : index
      %74 = vector.load %arg8[%c0_45, %c0_46] : memref<8x1xf32, #tpu.memory_space<vmem>>, vector<8x1xf32>
      tpu.vector_store %arg8[%c0_45, %c0_46], %55 {strides = array<i32>} : memref<8x1xf32, #tpu.memory_space<vmem>>, vector<8x1xf32>,
    }
    %c0_19 = arith.constant 0 : index
    %c0_20 = arith.constant 0 : index
    %23 = vector.load %arg9[%c0_19, %c0_20] : memref<8x1xf32, #tpu.memory_space<vmem>>, vector<8x1xf32>
    %24 = tpu.reciprocal %23 {approx = true} : vector<8x1xf32> -> vector<8x1xf32>
    %c0_21 = arith.constant 0 : index
    %c0_22 = arith.constant 0 : index
    %25 = vector.load %arg10[%c0_21, %c0_22] : memref<8x16xf32, #tpu.memory_space<vmem>>, vector<8x16xf32>
    %26 = vector.broadcast %24 : vector<8x1xf32> to vector<8x16xf32>
    %27 = arith.mulf %25, %26 : vector<8x16xf32>
    %c0_23 = arith.constant 0 : index
    %c0_24 = arith.constant 0 : index
    %c0_25 = arith.constant 0 : index
    %28 = vector.load %arg4[%c0_23, %c0_24, %c0_25] : memref<1x8x16xf32, #tpu.memory_space<vmem>>, vector<1x8x16xf32>
    %29 = vector.shape_cast %28 : vector<1x8x16xf32> to vector<8x16xf32>
    %30 = vector.shape_cast %27 : vector<8x16xf32> to vector<1x8x16xf32>
    tpu.vector_store %arg4[%c0_23, %c0_24, %c0_25], %30 {strides = array<i32>} : memref<1x8x16xf32, #tpu.memory_space<vmem>>, vector<1x8x16xf32>,
    return
  }
  func.func @transform_0(%arg0: i32, %arg1: i32) -> (i32, i32, i32) {
    %c0_i32 = arith.constant 0 : i32
    %c0_i32_0 = arith.constant 0 : i32
    %c0_i32_1 = arith.constant 0 : i32
    return %arg0, %c0_i32, %c0_i32_0 : i32, i32, i32
  }
  func.func @transform_1(%arg0: i32, %arg1: i32) -> (i32, i32) {
    %c0_i32 = arith.constant 0 : i32
    %c0_i32_0 = arith.constant 0 : i32
    %c0_i32_1 = arith.constant 0 : i32
    return %c0_i32, %c0_i32_0 : i32, i32
  }
  func.func @transform_2(%arg0: i32, %arg1: i32) -> (i32, i32, i32) {
    %c0_i32 = arith.constant 0 : i32
    %c0_i32_0 = arith.constant 0 : i32
    return %arg0, %arg1, %c0_i32 : i32, i32, i32
  }
}

</mosaic_0001>

<bundles_post_ra>
// kernel: tpu_custom_call.1
= control target key start
LH: loop header
LB: loop body
LE: loop exit
PB: predicated region body
PF: predicated region fallthrough
CT: control target
= control target key end

     0   :  { %7 = vsyncpa [#allocation9], 0  ;;  %s966_s0 = inlined_call_operand.hbm [shape: f32[2,8,32], index: 0, kind: input, shape index: {}]   ;;  %s967_s1 = inlined_call_operand.hbm [shape: f32[32,48], index: 1, kind: input, shape index: {}]   ;;  %s968_s2 = inlined_call_operand.hbm [shape: f32[2,8,16], index: 2, kind: output, shape index: {}]  }
   0x1   :  { %9 = vsyncpa [#allocation9 + $0x1], 0 }
   0x2   :  { %10 = vsyncpa [#allocation12], 0 }
   0x3   :  { %11 = vsyncpa [#allocation10], 0 }
   0x4   :  { %13 = vsyncpa [#allocation10 + $0x1], 0  ;;  %s784_s9 = smov 0   ;;  %s786_s10 = smov 0  }
   0x5   :  { %s788_s11 = smov 0   ;;  %s790_s12 = smov 0  }
   0x6   :  { %s792_s13 = smov 0   ;;  %s794_s14 = smov 0  }
   0x7 LB: > { %s485_s15 = sadd.s32 4294967295, %s754_s14   ;;  %p487_p0 = scmp.ge.s32.totalorder %s754_s14, 1  ;;  %s754_s14 = sphi %s794_s14, %s19_s14   ;;  %s750_s13 = sphi %s792_s13, %s979_s13   ;;  %s746_s12 = sphi %s790_s12, %s978_s12   ;;  %s742_s11 = sphi %s788_s11, %s977_s11   ;;  %s738_s10 = sphi %s786_s10, %s976_s10   ;;  %s734_s9 = sphi %s784_s9, %s975_s9  }
   0x8   : > { %p816_p1 = scmp.eq.s32.totalorder %s485_s15, 0  ;;  %p111_p2 = scmp.lt.s32.totalorder %s754_s14, 3 }
   0x9   : > { %s122_s19 = sshll.u32 %s967_s1, 4  ;;  %s760_s21 = smov [#allocation11]   ;;  %s123_s19 = int_to_ptr.hbm [resolvable:$true] %s122_s19 }
   0xa   : > { %p824_p3 = pnand %p487_p0, %p111_p2  ;;  %s124_s22 = sshll.u32 %s760_s21, 4  ;;  %s125_s22 = int_to_ptr.vmem [resolvable:$true] %s124_s22 }
   0xb   : > { %p489_p6 = scmp.ge.s32.totalorder %s754_s14, 2  ;;  %s761_s23 = smov 128  }
   0xc   : > { %p514_p4 = pneg %p824_p3  ;;  %s762_s24 = smov 8  }
   0xd   : > { %s486_s25 = sadd.s32 4294967294, %s754_s14   ;;  %s31_s26 = sadd.s32 1, %s750_s13 }
   0xe   : > { %p515_p5 = pnand %p514_p4, %p816_p1  ;;  %s38_s27 = sadd.s32 1, %s742_s11 }
   0xf   : > { %p33_p7 = scmp.ge.s32.totalorder %s31_s26, 2  ;;  %p45_p8 = scmp.ne.s32.totalorder %s742_s11, %s738_s10 }
  0x10   : > { %517 = dma.hbm_to_vmem [thread:$0]  (!%p515_p5), %s123_s19, 512, %s125_s22, [#allocation12], %s761_s23, %s761_s23, %s762_s24  }
  0x11   : > { %p46_p9 = scmp.eq.s32.totalorder %s754_s14, 0  ;;  %p51_p10 = scmp.ne.s32.totalorder %s738_s10, %s734_s9 }
  0x12   : > { %s981_s26 = smov (%p33_p7, %s31_s26), 0  ;;  %p98_p13 = scmp.eq.s32.totalorder %s485_s15, 1 }
  0x13   : > { %p843_p11 = por %p46_p9, %p45_p8  ;;  %p849_p12 = por %p816_p1, %p51_p10 }
  0x14   : > { %s35_s30 = ssub.s32 %s750_s13, %s981_s26  ;;  %p104_p2 = scmp.eq.s32.totalorder %s486_s25, 1 }
  0x15   : > { %p36_p0 = scmp.eq.s32.totalorder %s35_s30, 0  ;;  %p855_p4 = por %p98_p13, %p45_p8 }
  0x16   : > { %p527_p5 = scmp.lt.s32.totalorder %s754_s14, 2  ;;  %p863_p7 = por %p104_p2, %p51_p10 }
  0x17   : > { %s861_s4 = scalar_select %p36_p0, %s742_s11, %s38_s27  }
  0x18   : > { %s138_s6 = sand.u32 1, %s742_s11   ;;  %s491_s8 = sshll.u32 %s750_s13, 3 }
  0x19   : > { %s490_s7 = sshll.u32 %s138_s6, 3  ;;  %s146_s15 = scalar_lea.hbm %s966_s0, %s491_s8 }
  0x1a   : > { %s142_s19 = scalar_lea.vmem [#allocation8], %s490_s7  ;;  %s148_s22 = sshll.u32 %s146_s15, 4  ;;  %s149_s22 = int_to_ptr.hbm [resolvable:$true] %s148_s22 }
  0x1b   : > { %s150_s21 = sshll.u32 %s142_s19, 4  ;;  %p519_p8 = pnand %p527_p5, %p843_p11  ;;  %s151_s21 = int_to_ptr.vmem [resolvable:$true] %s150_s21 }
  0x1c   : > { %s139_s23 = scalar_lea.sflag [#allocation9], %s138_s6  ;;  %159 = sbr.rel (%p824_p3) target bundleno = 938 (0x3aa), region = 28 }
  0x1d   : > { %521 = dma.hbm_to_vmem [thread:$0]  (!%p519_p8), %s149_s22, 128, %s151_s21, %s139_s23  }
  0x1e   : > { %s877_s24 = sand.u32 (!%p824_p3), 1, %s738_s10  }
  0x1f   : > { %s493_s25 = sshll.u32 (!%p824_p3), %s877_s24, 3  ;;  %s162_s27 = scalar_lea.sflag (!%p824_p3), [#allocation9], %s877_s24 }
  0x20   : > { %s165_s30 = scalar_lea.vmem (!%p824_p3), [#allocation8], %s493_s25 }
  0x21   : > { %721 = dma.done.wait (%p849_p12), %s162_s27, 128  }
  0x22   : > { %723 = vsyncadd (%p849_p12), %s162_s27, 4294967168 }
  0x23   : > { %725 = dma.done.wait (%p816_p1), [#allocation12], 512  }
  0x24   : > { %727 = vsyncadd (%p816_p1), [#allocation12], 4294966784  ;;  %vm242_vm0 = vcmask 7168   ;;  %vm245_vm1 = vcmask 130048   ;;  %v763_v0 = vmov -inf   ;;  %v764_v1 = vmov 0.0  }
  0x25   : > { %243 = vst.msk [vmem:[#allocation5] sm:$0xff] %vm242_vm0, %v763_v0  ;;  %v201_v2 = vld [vmem:[#allocation11 + $0x10] sm:$0xff]  ;;  %v202_v3 = vld [vmem:[#allocation11 + $0x18] sm:$0xff]  ;;  %v199_v4 = vld [vmem:[#allocation11] sm:$0xff]  ;;  %vm205_vm2 = vcmask 261120   ;;  %vm224_vm3 = vcmask 125952  }
  0x26   : > { %244 = vst.msk [vmem:[#allocation6] sm:$0xff] %vm242_vm0, %v764_v1  ;;  %v204_v5 = vpack.c.bf16 %v202_v3, %v201_v2  ;;  %v200_v6 = vld [vmem:[#allocation11 + $0x8] sm:$0xff]  ;;  %v197_v8 = vld [vmem:[%s165_s30] sm:$0xff]  ;;  %s765_s16 = smov 112   ;;  %s766_s20 = smov 96  }
  0x27   : > { %246 = vst.msk [vmem:[#allocation7] sm:$0xff] %vm245_vm1, %v764_v1  ;;  %v203_v7 = vpack.c.bf16 %v200_v6, %v199_v4  ;;  %v198_v9 = vpack.c.bf16 %v197_v8, %v197_v8  ;;  %s898_s28 = scalar_lea.vmem [#allocation13], %s493_s25  ;;  %s900_s29 = smov 0  }
  0x28   : > { %215 = vmatpush.bf16.msra.mxu0 %v204_v5 }
  0x2c   : > { %216 = vmatpush.bf16.msra.mxu0 %v203_v7 }
  0x2f   : > { %496 = vmatmul.msk.bf16.vlgmr.msra.gmra.mxu0 %vm205_vm2, %v198_v9 }
  0xac   : > { %v218_v10 = vpop.f32.mrf.mxu0 }
  0xad   : > { %v222_v11 = vmul.f32 0.17677669, %v218_v10  ;;  %v226_v12 = vpack.c.bf16 %v218_v10, %v218_v10 }
  0xaf   : > { %v223_v13 = vpack.c.bf16 %v222_v11, %v222_v11  ;;  %228 = vrot.lane.b32.xlu0 %v226_v12, %s765_s16 }
  0xb1   : > { %225 = vst.msk [vmem:[#allocation2] sm:$0xf] %vm224_vm3, %v223_v13 }
  0xb4   : > { %v220_v14 = vpop.f32.mrf.mxu0 }
  0xb7   : > { %232 = vrot.lane.b32.xlu0 %v226_v12, %s766_s20 }
  0xb8   : > { %v894_v15 = vld [vmem:[#allocation2] sm:$0xf] }
 0x121   : > { %v229_v16 = vpop.permute.xlu0 %228 }
 0x122   : > { %231 = vst.msk [vmem:[#allocation3] sm:$0xf] %vm224_vm3, %v229_v16 }
 0x129   : > { %v233_v17 = vpop.permute.xlu0 %232 }
 0x12a   : > { %235 = vst.msk [vmem:[#allocation4] sm:$0xf] %vm224_vm3, %v233_v17 }
 0x12b LB: >> { %s497_s6 = sshll.u32 %s758_s29, 3  ;;  %v291_v20 = vlaneseq  ;;  %vm304_vm7 = vcmask 64512   ;;  %v767_v29 = vmov 0   ;;  %v303_v30 = vld [vmem:[#allocation5] sm:$0xff]  ;;  %vm338_vm8 = vcmask 1043456   ;;  %v320_v45 = vld [vmem:[#allocation6] sm:$0xff]  ;;  %s758_s29 = sphi %s900_s29, %s260_s29  }
 0x12c   : >> { %s906_s7 = sshra.s32 %s497_s6, 3  ;;  %v297_v22 = vstv %s497_s6  ;;  %595 = vset.pattern.permute.xlu0 %v767_v29  ;;  %596 = vset.pattern.permute.xlu1 %v767_v29  ;;  %v327_v49 = vld [vmem:[#allocation7] sm:$0xff]  ;;  %s260_s29 = sadd.s32 1, %s758_s29  }
 0x12d   : >> { %s498_s8 = sshll.u32 %s906_s7, 2  ;;  %v296_v21 = vand.u32 127, %v291_v20  ;;  %v292_v23 = vshrl.u32 %v291_v20, 7  ;;  %p259_p1 = scmp.ge.s32.totalorder %s260_s29, 1 }
 0x12e   : >> { %s267_s17 = scalar_lea.vmem [#allocation3], %s498_s8  ;;  %s270_s18 = scalar_lea.vmem [#allocation4], %s498_s8  ;;  %v768_v55 = vmov (%p259_p1), 0  }
 0x12f   : >> { %v268_v18 = vld [vmem:[%s267_s17] sm:$0xf]  ;;  %v298_v24 = vadd.s32 %v297_v22, %v296_v21  ;;  %s503_s15 = sshll.u32 (%p259_p1), %s746_s12, 3  ;;  %s382_s23 = sshll.u32 (%p259_p1), %s898_s28, 4  ;;  %s383_s23 = int_to_ptr.vmem [resolvable:$true] %s382_s23 }
 0x130   : >> { %v276_v19 = vsel %vm245_vm1, %v268_v18, 0  ;;  %s380_s22 = scalar_lea.hbm (%p259_p1), %s968_s2, %s503_s15  ;;  %s369_s27 = scalar_lea.sflag (%p259_p1), [#allocation10], %s877_s24 }
 0x131   : >> { %285 = vmatpush.bf16.xpose.msra.mxu0 %v276_v19  ;;  %vm299_vm4 = vcmp.le.s32.totalorder %v298_v24, %v292_v23  ;;  %vm300_vm5 = vcmp.lt.s32.totalorder %v298_v24, 8  ;;  %v271_v36 = vld [vmem:[%s270_s18] sm:$0xf]  ;;  %s384_s25 = sshll.u32 (%p259_p1), %s380_s22, 4  ;;  %s684_s29 = scalar_lea.hbm (%p259_p1), %s968_s2, 16  ;;  %s385_s25 = int_to_ptr.hbm [resolvable:$true] %s384_s25 }
 0x132   : >> { %vm301_vm6 = vmand %vm299_vm4, %vm300_vm5  ;;  %v340_v37 = vsel %vm338_vm8, %v271_v36, 0  ;;  %s678_s30 = sshra.s32 (%p259_p1), %s385_s25, 4  ;;  %s679_s30 = int_to_ptr.hbm [resolvable:$true] %s678_s30 }
 0x133   : >> { %349 = vmatpush.bf16.msra.mxu1 %v340_v37  ;;  %s680_s16 = scalar_lea.hbm (%p259_p1), %s679_s30, 8  ;;  %p685_p11 = scmp.lt.s32.totalorder (%p259_p1), %s679_s30, %s968_s2 }
 0x134   : > { %p681_p3 = scmp.ne.s32.totalorder (%p259_p1), %s679_s30, %s680_s16  ;;  %p686_p12 = scmp.lt.s32.totalorder (%p259_p1), %s684_s29, %s680_s16 }
 0x136   : > { %p682_p9 = pnand (%p259_p1), %p681_p3, %p855_p4  ;;  %p687_p13 = por (%p259_p1), %p686_p12, %p685_p11 }
 0x138   : >> { %500 = vmatmul.msk.bf16.vlgmr.msra.gmra.mxu0 %vm245_vm1, %v894_v15  ;;  %p683_p10 = pneg (%p259_p1), %p682_p9 }
 0x13a   : > { %p688_p0 = pnand (%p259_p1), %p687_p13, %p683_p10 }
 0x1b5   : >> { %v287_v25 = vpop.f32.mrf.mxu0 }
 0x1b6   : >> { %v302_v26 = vsel %vm301_vm6, %v287_v25, -1e+30 }
 0x1b7   : >> { %v305_v27 = vsel %vm304_vm7, %v302_v26, -inf }
 0x1b8   : >> { %306 = vmax.xlane.f32.xlu0 %v305_v27 }
 0x1bd   : >> { %v289_v28 = vpop.f32.mrf.mxu0 }
 0x22b   : >> { %v307_v31 = vpop.xlane.xlu0 %306 }
 0x22c   : >> { %v308_v32 = vmax.f32 %v303_v30, %v307_v31 }
 0x22e   : >> { %v309_v33 = vsub.f32 %v303_v30, %v308_v32  ;;  %357 = vst.msk [vmem:[#allocation5] sm:$0xff] %vm242_vm0, %v308_v32  ;;  %314 = vperm.xlu0 %595, %v308_v32  }
 0x230   : >> { %v310_v34 = vmul.f32 1.442695, %v309_v33 }
 0x232   : >> { %597 = vpow2.f32 %v310_v34 }
 0x236   : > { %601 = vset.pattern.permute.xlu0 (%p259_p1), %v768_v55 }
 0x238   : >> { %v598_v35 = vpop.eup %597 }
 0x239   : >> { %330 = vperm.xlu1 %596, %v598_v35   ;;  %v321_v46 = vmul.f32 %v598_v35, %v320_v45 }
 0x2a0   : >> { %v315_v38 = vpop.permute.xlu0 %314 }
 0x2a1   : >> { %v317_v39 = vsub.f32 %v302_v26, %v315_v38 }
 0x2a3   : >> { %v318_v40 = vmul.f32 1.442695, %v317_v39 }
 0x2a5   : >> { %599 = vpow2.f32 %v318_v40 }
 0x2ab   : >> { %v600_v41 = vpop.eup %599  ;;  %v331_v44 = vpop.permute.xlu1 %330 }
 0x2ac   : >> { %v322_v42 = vsel %vm304_vm7, %v600_v41, 0.0  ;;  %v334_v43 = vpack.c.bf16 %v600_v41, %v600_v41  ;;  %v333_v50 = vmul.f32 %v331_v44, %v327_v49 }
 0x2ad   : >> { %323 = vadd.xlane.f32.xlu1 %v322_v42 }
 0x2ae   : >> { %501 = vmatmul.msk.bf16.vlgmr.msra.gmra.mxu1 %vm304_vm7, %v334_v43 }
 0x320   : >> { %v324_v47 = vpop.xlane.xlu1 %323 }
 0x321   : >> { %v325_v48 = vadd.f32 %v324_v47, %v321_v46 }
 0x323   : >> { %326 = vst.msk [vmem:[#allocation6] sm:$0xff] %vm242_vm0, %v325_v48 }
 0x32a   : > { %v358_v54 = vld [vmem:[#allocation6] sm:$0xff] (%p259_p1) }
 0x32b   : >> { %v351_v51 = vpop.f32.mrf.mxu1  ;;  %602 = vrcp.f32 (%p259_p1), %v358_v54 }
 0x32c   : >> { %v355_v52 = vadd.f32 %v351_v51, %v333_v50 }
 0x32e   : >> { %356 = vst.msk [vmem:[#allocation7] sm:$0xff] %vm245_vm1, %v355_v52 }
 0x331   : > { %v603_v56 = vpop.eup (%p259_p1), %602 }
 0x332   : > { %262 = sbr.rel (!%p259_p1) target bundleno = 299 (0x12b), region = 91  ;;  %363 = vperm.xlu0 (%p259_p1), %601, %v603_v56  }
 0x333   : >> { %v353_v53 = vpop.f32.mrf.mxu1 }
 0x335   : > { %v360_v57 = vld [vmem:[#allocation7] sm:$0xff] (%p259_p1) }
 0x3a4   : > { %v364_v58 = vpop.permute.xlu0 %363 }
 0x3a5   : > { %v366_v59 = vmul.f32 %v364_v58, %v360_v57 }
 0x3a7   : > { %367 = vst.msk [vmem:[%s898_s28] sm:$0xff] %vm245_vm1, %v366_v59 }
 0x3a8   : > { %691 = shalt.err (!%p688_p0)
}
 0x3a9   : > { %512 = dma.vmem_to_hbm [thread:$0]  (%p855_p4), %s383_s23, 128, %s385_s25, %s369_s27  }
 0x3aa PF: > { %s396_s24 = sand.u32 1, %s734_s9   ;;  %p523_p2 = pnand %p489_p6, %p863_p7 }
 0x3ab   : > { %s397_s28 = scalar_lea.sflag [#allocation10], %s396_s24 }
 0x3ac   : > { %p524_p5 = pneg %p523_p2 }
 0x3ae   : > { %729 = dma.done.wait (%p524_p5), %s397_s28, 128  }
 0x3af   : > { %731 = vsyncadd (%p524_p5), %s397_s28, 4294967168  ;;  %s19_s14 = sadd.s32 1, %s754_s14   ;;  %s975_s9 = smov %s738_s10 }
 0x3b0   : > { %p16_p8 = scmp.ge.s32.totalorder %s19_s14, 4   ;;  %s976_s10 = smov %s742_s11 }
 0x3b1   : > { %s977_s11 = smov %s861_s4  ;;  %s978_s12 = smov %s750_s13 }
 0x3b2   : > { %s979_s13 = smov %s981_s26  ;;  %18 = sbr.rel (!%p16_p8) target bundleno = 7 (0x7), region = 102 }
 0x3b7   :  { %403 = vsyncpa [#allocation9], 1 }
 0x3b8   :  { %405 = vsyncpa [#allocation9 + $0x1], 1 }
 0x3b9   :  { %406 = vsyncpa [#allocation12], 1 }
 0x3ba   :  { %407 = vsyncpa [#allocation10], 1 }
 0x3bb   :  { %409 = vsyncpa [#allocation10 + $0x1], 1 }

</bundles_post_ra>
